<compile_context>
chip_gen: v7x
topology: tpu7x:2x2x1
jax: 0.10.0
libtpu: 0.0.40
codegen_flags: <defaults>
</compile_context>

<pallas_src>
import functools

import jax
import jax.numpy as jnp
from jax.experimental import pallas as pl
from jax.experimental.pallas import tpu as pltpu


# ----------------------------- Pallas kernels -------------------------------
def _bottleneck_kernel_single_k(x_ref, w_ref, b_ref, o_ref):
    # Whole reduction in one tile: fused GEMM + bias + ReLU, no scratch.
    acc = jnp.dot(x_ref[...], w_ref[...], preferred_element_type=jnp.float32)
    o_ref[...] = jnp.maximum(acc + b_ref[...], 0.0).astype(o_ref.dtype)


def _bottleneck_kernel_multi_k(x_ref, w_ref, b_ref, o_ref, acc_ref):
    # x_ref: (tm, tk) bf16, w_ref: (tk, tn) bf16, b_ref: (1, tn) f32,
    # o_ref: (tm, tn) f32, acc_ref: (tm, tn) f32 scratch.
    k = pl.program_id(2)

    @pl.when(k == 0)
    def _():
        acc_ref[...] = jnp.zeros_like(acc_ref)

    acc_ref[...] += jnp.dot(x_ref[...], w_ref[...],
                            preferred_element_type=jnp.float32)

    @pl.when(k == pl.num_programs(2) - 1)
    def _():
        acc = acc_ref[...] + b_ref[...]
        o_ref[...] = jnp.maximum(acc, 0.0).astype(o_ref.dtype)


def _round_up(x, m):
    return ((x + m - 1) // m) * m


def _pick_tile(dim_pad, candidates):
    for c in candidates:
        if dim_pad % c == 0:
            return c
    return candidates[-1]


def bottleneck_conv_relu(x_flat, w, b):
    """Fused 1x1 conv (as GEMM) + bias + ReLU on the MXU.

    x_flat: (M, K) f32, w: (K, O) f32, b: (O,) f32 -> (M, O) f32.
    """
    m, k = x_flat.shape
    o = w.shape[1]

    # ---- tile selection (lane/sublane aligned, VMEM-friendly on all chips)
    if m >= 4096:
        tm = 512
    elif m >= 256:
        tm = 256
    else:
        tm = _round_up(m, 8)                     # tiny case: single M tile
    m_pad = _round_up(m, tm)
    k_pad = _round_up(k, 128)
    o_pad = _round_up(o, 128)
    tn = _pick_tile(o_pad, (512, 256, 128))

    single_k = k_pad <= 1024                      # whole reduction in one tile
    tk = k_pad if single_k else _pick_tile(k_pad, (512, 256, 128))

    # ---- pad operands (zero pad contributes nothing to the GEMM) and cast
    #      to bf16 for the MXU; bias stays f32.
    x_p = jnp.pad(x_flat.astype(jnp.bfloat16),
                  ((0, m_pad - m), (0, k_pad - k)))
    w_p = jnp.pad(w.astype(jnp.bfloat16),
                  ((0, k_pad - k), (0, o_pad - o)))
    b_p = jnp.pad(b.astype(jnp.float32), (0, o_pad - o)).reshape(1, o_pad)

    # ---- advisory cost + VMEM budget (2 buffers per operand + f32 accumulator)
    cost = pl.CostEstimate(
        flops=2 * m_pad * k_pad * o_pad,
        transcendentals=0,
        bytes_accessed=m_pad * k_pad * 2 + k_pad * o_pad * 2
        + o_pad * 4 + m_pad * o_pad * 4,
    )
    vmem_need = (2 * (tm * tk * 2 + tk * tn * 2 + tn * 4 + tm * tn * 4)
                 + tm * tn * 4)
    vmem_limit = min(max(4 * vmem_need, 16 * 1024 * 1024), 32 * 1024 * 1024)

    if single_k:
        grid = (m_pad // tm, o_pad // tn)
        y_pad = pl.pallas_call(
            _bottleneck_kernel_single_k,
            out_shape=jax.ShapeDtypeStruct((m_pad, o_pad), x_flat.dtype),
            grid_spec=pltpu.PrefetchScalarGridSpec(
                num_scalar_prefetch=0,
                grid=grid,
                in_specs=[
                    pl.BlockSpec((tm, k_pad), lambda i, j: (i, 0)),
                    pl.BlockSpec((k_pad, tn), lambda i, j: (0, j)),
                    pl.BlockSpec((1, tn), lambda i, j: (0, j)),
                ],
                out_specs=pl.BlockSpec((tm, tn), lambda i, j: (i, j)),
            ),
            compiler_params=pltpu.CompilerParams(
                dimension_semantics=("parallel", "parallel"),
                vmem_limit_bytes=vmem_limit,
            ),
            cost_estimate=cost,
        )(x_p, w_p, b_p)
    else:
        grid = (m_pad // tm, o_pad // tn, k_pad // tk)
        y_pad = pl.pallas_call(
            _bottleneck_kernel_multi_k,
            out_shape=jax.ShapeDtypeStruct((m_pad, o_pad), x_flat.dtype),
            grid_spec=pltpu.PrefetchScalarGridSpec(
                num_scalar_prefetch=0,
                grid=grid,
                in_specs=[
                    pl.BlockSpec((tm, tk), lambda i, j, kk: (i, kk)),
                    pl.BlockSpec((tk, tn), lambda i, j, kk: (kk, j)),
                    pl.BlockSpec((1, tn), lambda i, j, kk: (0, j)),
                ],
                out_specs=pl.BlockSpec((tm, tn), lambda i, j, kk: (i, j)),
                scratch_shapes=[pltpu.VMEM((tm, tn), jnp.float32)],
            ),
            compiler_params=pltpu.CompilerParams(
                dimension_semantics=("parallel", "parallel", "arbitrary"),
                vmem_limit_bytes=vmem_limit,
            ),
            cost_estimate=cost,
        )(x_p, w_p, b_p)

    return y_pad[:m, :o]


# ------------------------------- JAX glue (NHWC) -----------------------------
def adaptive_avg_pool_nhwc(x, s):
    """Matches torch.nn.AdaptiveAvgPool2d((s, s)); x is NHWC."""
    _, h, w, _ = x.shape

    def pool_axis(arr, axis, in_size, out_size):
        pieces = []
        for i in range(out_size):
            start = (i * in_size) // out_size
            end = -((-(i + 1) * in_size) // out_size)  # ceil((i+1)*in/out)
            sl = jax.lax.slice_in_dim(arr, start, end, axis=axis)
            pieces.append(jnp.mean(sl, axis=axis, keepdims=True))
        return jnp.concatenate(pieces, axis=axis)

    x = pool_axis(x, 1, h, s)
    x = pool_axis(x, 2, w, s)
    return x


def upsample_bilinear_nhwc(x, out_h, out_w):
    """Matches F.interpolate(mode='bilinear', align_corners=False); x is NHWC."""
    _, in_h, in_w, _ = x.shape

    def coords(out_size, in_size):
        scale = in_size / out_size
        src = (jnp.arange(out_size, dtype=jnp.float32) + 0.5) * scale - 0.5
        src = jnp.maximum(src, 0.0)  # PyTorch clamps negative src to 0
        i0 = jnp.floor(src).astype(jnp.int32)
        i0 = jnp.minimum(i0, in_size - 1)
        i1 = jnp.minimum(i0 + 1, in_size - 1)
        lam = src - i0.astype(jnp.float32)
        return i0, i1, lam

    h0, h1, lh = coords(out_h, in_h)
    w0, w1, lw = coords(out_w, in_w)

    lh = lh[None, :, None, None]
    lw = lw[None, None, :, None]

    rows = (jnp.take(x, h0, axis=1) * (1.0 - lh)
            + jnp.take(x, h1, axis=1) * lh)
    out = (jnp.take(rows, w0, axis=2) * (1.0 - lw)
           + jnp.take(rows, w1, axis=2) * lw)
    return out


def _psp_concat_nhwc(x_nhwc, stage_ws, sizes, h, w):
    """Priors + identity, concatenated on the channel (last) axis."""
    priors = []
    for s, w_s in zip(sizes, stage_ws):
        p = adaptive_avg_pool_nhwc(x_nhwc, s)           # (N, s, s, C)
        p = jnp.einsum("nhwc,oc->nhwo", p, w_s)         # 1x1 conv, no bias
        p = upsample_bilinear_nhwc(p, h, w)             # (N, H, W, C)
        priors.append(p)
    priors.append(x_nhwc)
    return jnp.concatenate(priors, axis=-1)             # (N, H, W, K)


@functools.partial(jax.jit, static_argnames=("sizes",))
def psp_module(x, stage_ws, w_bottle, b_bottle, sizes=(1, 2, 3, 6)):
    """x: (N, C, H, W) NCHW (PyTorch convention). Returns (N, out_features, H, W)."""
    n, c, h, w = x.shape
    # Single small transpose of the raw input; everything downstream is NHWC,
    # so the wide concat tensor never needs an HBM-level layout change.
    x_nhwc = jnp.transpose(x, (0, 2, 3, 1))
    cat = _psp_concat_nhwc(x_nhwc, stage_ws, sizes, h, w)
    x_flat = cat.reshape(n * h * w, -1)                 # free reshape (NHWC-contig)
    y_flat = bottleneck_conv_relu(x_flat, w_bottle, b_bottle)
    y = y_flat.reshape(n, h, w, -1).transpose(0, 3, 1, 2)  # back to NCHW
    return y


# --------------------------------- main --------------------------------------
if __name__ == "__main__":
    N, C, H, W = 2, 4, 16, 16          # features = 4, spatial 16 (small demo)
    sizes = (1, 2, 3, 6)
    out_features = 128                  # small stand-in for default 1024
    K = C * (len(sizes) + 1)

    key = jax.random.PRNGKey(0)
    k_x, k_w, k_b, *k_stages = jax.random.split(key, 3 + len(sizes))

    x = jax.random.normal(k_x, (N, C, H, W), dtype=jnp.float32)
    # Deterministic synthetic parameters (shapes from the module's __init__):
    #   stage convs: Conv2d(C, C, 1, bias=False)  -> (C, C)
    #   bottleneck : Conv2d(K, out_features, 1)   -> (K, out_features) + bias
    stage_ws = tuple(
        jax.random.normal(k, (C, C), dtype=jnp.float32) * 0.1 for k in k_stages
    )
    w_bottle = jax.random.normal(k_w, (K, out_features), dtype=jnp.float32) * 0.1
    b_bottle = jax.random.normal(k_b, (out_features,), dtype=jnp.float32) * 0.1

    out = psp_module(x, stage_ws, w_bottle, b_bottle, sizes=sizes)
    out = jax.block_until_ready(out)
    assert out.shape == (N, out_features, H, W), out.shape

    # Sanity check: Pallas GEMM+bias+ReLU vs a reference using the same glue
    # and the same bf16 operand quantization (f32 accumulation).
    x_nhwc = jnp.transpose(x, (0, 2, 3, 1))
    cat = _psp_concat_nhwc(x_nhwc, stage_ws, sizes, H, W)
    x_flat = cat.reshape(N * H * W, K)
    xq = x_flat.astype(jnp.bfloat16).astype(jnp.float32)
    wq = w_bottle.astype(jnp.bfloat16).astype(jnp.float32)
    ref = jnp.maximum(
        jnp.matmul(xq, wq, precision=jax.lax.Precision.HIGHEST) + b_bottle, 0.0)
    ref = ref.reshape(N, H, W, out_features).transpose(0, 3, 1, 2)
    assert jnp.allclose(out, ref, atol=2e-3, rtol=2e-3), float(
        jnp.max(jnp.abs(out - ref)))

    print("KERNEL_OK")
</pallas_src>

<mosaic_0001>
module attributes {stable_mosaic.version = 11 : i64} {
  func.func @_bottleneck_kernel_single_k(%arg0: i32, %arg1: i32, %arg2: memref<256x128xbf16, #tpu.memory_space<vmem>>, %arg3: memref<128x128xbf16, #tpu.memory_space<vmem>>, %arg4: memref<1x128xf32, #tpu.memory_space<vmem>>, %arg5: memref<256x128xf32, #tpu.memory_space<vmem>>) attributes {dimension_semantics = [#tpu.dimension_semantics<parallel>, #tpu.dimension_semantics<parallel>], iteration_bounds = array<i64: 2, 1>, scalar_prefetch = 0 : i64, scratch_operands = 0 : i64, tpu.core_type = #tpu.core_type<tc>, window_params = [{transform_indices = @transform_0, window_bounds = array<i64: 256, 128>}, {transform_indices = @transform_1, window_bounds = array<i64: 128, 128>}, {transform_indices = @transform_2, window_bounds = array<i64: 1, 128>}, {transform_indices = @transform_3, window_bounds = array<i64: 256, 128>}]} {
    %c0 = arith.constant 0 : index
    %c0_0 = arith.constant 0 : index
    %0 = vector.load %arg2[%c0, %c0_0] : memref<256x128xbf16, #tpu.memory_space<vmem>>, vector<256x128xbf16>
    %c0_1 = arith.constant 0 : index
    %c0_2 = arith.constant 0 : index
    %1 = vector.load %arg3[%c0_1, %c0_2] : memref<128x128xbf16, #tpu.memory_space<vmem>>, vector<128x128xbf16>
    %cst = arith.constant dense<0.000000e+00> : vector<256x128xf32>
    %2 = tpu.matmul %0, %1, %cst {dimension_numbers = #tpu.dot_dimension_numbers<[1], [0], [0], [1], [0, 0, 1, 1], [], []>} : vector<256x128xbf16>, vector<128x128xbf16>, vector<256x128xf32> -> vector<256x128xf32>
    %c0_3 = arith.constant 0 : index
    %c0_4 = arith.constant 0 : index
    %3 = vector.load %arg4[%c0_3, %c0_4] : memref<1x128xf32, #tpu.memory_space<vmem>>, vector<1x128xf32>
    %4 = vector.broadcast %3 : vector<1x128xf32> to vector<256x128xf32>
    %5 = arith.addf %2, %4 : vector<256x128xf32>
    %cst_5 = arith.constant 0.000000e+00 : f32
    %6 = vector.broadcast %cst_5 : f32 to vector<256x128xf32>
    %7 = arith.maximumf %5, %6 : vector<256x128xf32>
    %c0_6 = arith.constant 0 : index
    %c0_7 = arith.constant 0 : index
    %8 = vector.load %arg5[%c0_6, %c0_7] : memref<256x128xf32, #tpu.memory_space<vmem>>, vector<256x128xf32>
    tpu.vector_store %arg5[%c0_6, %c0_7], %7 {strides = array<i32>} : memref<256x128xf32, #tpu.memory_space<vmem>>, vector<256x128xf32>,
    return
  }
  func.func @transform_0(%arg0: i32, %arg1: i32) -> (i32, i32) {
    %c0_i32 = arith.constant 0 : i32
    %c0_i32_0 = arith.constant 0 : i32
    return %arg0, %c0_i32 : i32, i32
  }
  func.func @transform_1(%arg0: i32, %arg1: i32) -> (i32, i32) {
    %c0_i32 = arith.constant 0 : i32
    %c0_i32_0 = arith.constant 0 : i32
    return %c0_i32, %arg1 : i32, i32
  }
  func.func @transform_2(%arg0: i32, %arg1: i32) -> (i32, i32) {
    %c0_i32 = arith.constant 0 : i32
    %c0_i32_0 = arith.constant 0 : i32
    return %c0_i32, %arg1 : i32, i32
  }
  func.func @transform_3(%arg0: i32, %arg1: i32) -> (i32, i32) {
    %c0_i32 = arith.constant 0 : i32
    return %arg0, %arg1 : i32, i32
  }
}

</mosaic_0001>

<bundles_post_ra>
// kernel: psp_module.1
= control target key start
LH: loop header
LB: loop body
LE: loop exit
PB: predicated region body
PF: predicated region fallthrough
CT: control target
= control target key end

     0   :  { %8 = vsyncpa [#allocation3], 0  ;;  %s1301_s0 = inlined_call_operand.vmem [shape: bf16[512,128], index: 0, kind: input, shape index: {}]   ;;  %s1302_s1 = inlined_call_operand.vmem [shape: bf16[128,128], index: 1, kind: input, shape index: {}]   ;;  %s1303_s2 = inlined_call_operand.vmem [shape: f32[1,128], index: 2, kind: input, shape index: {}]   ;;  %s1304_s3 = inlined_call_operand.hbm [shape: f32[512,128], index: 3, kind: output, shape index: {}]  }
   0x1   :  { %10 = vsyncpa [#allocation3 + $0x1], 0  ;;  %s1069_s12 = smov 0   ;;  %s1071_s13 = smov 0  }
   0x2   :  { %s1073_s14 = smov 0   ;;  %s1075_s15 = smov 0  }
   0x3   :  { %s1077_s16 = smov 0   ;;  %s1079_s17 = smov 0  }
   0x4 LB: > { %s756_s18 = sadd.s32 4294967295, %s1044_s17   ;;  %s757_s19 = sadd.s32 4294967294, %s1044_s17   ;;  %s1044_s17 = sphi %s1079_s17, %s16_s17   ;;  %s1040_s16 = sphi %s1077_s16, %s1311_s16   ;;  %s1036_s15 = sphi %s1075_s15, %s1310_s15   ;;  %s1032_s14 = sphi %s1073_s14, %s1309_s14   ;;  %s1028_s13 = sphi %s1071_s13, %s1308_s13   ;;  %s1024_s12 = sphi %s1069_s12, %s1307_s12  }
   0x5   : > { %s28_s20 = sadd.s32 1, %s1040_s16  ;;  %s115_s21 = sadd.s32 1, %s1032_s14 }
   0x6   : > { %p30_p0 = scmp.ge.s32.totalorder %s28_s20, 2  ;;  %p125_p1 = scmp.ne.s32.totalorder %s1032_s14, %s1028_s13 }
   0x7   : > { %p126_p2 = scmp.eq.s32.totalorder %s756_s18, 1  ;;  %p131_p3 = scmp.ne.s32.totalorder %s1028_s13, %s1024_s12 }
   0x8   : > { %s1313_s20 = smov (%p30_p0, %s28_s20), 0  ;;  %p132_p5 = scmp.eq.s32.totalorder %s757_s19, 1 }
   0x9   : > { %p1109_p4 = por %p126_p2, %p125_p1  ;;  %s110_s23 = ssub.s32 %s1040_s16, %s1313_s20 }
   0xa   : > { %p762_p6 = scmp.ge.s32.totalorder %s1044_s17, 1  ;;  %p113_p7 = scmp.eq.s32.totalorder %s110_s23, 0 }
   0xb   : > { %p1116_p8 = por %p132_p5, %p131_p3  ;;  %p172_p9 = scmp.lt.s32.totalorder %s1044_s17, 3 }
   0xc   : > { %s1122_s25 = scalar_select %p113_p7, %s1032_s14, %s115_s21  }
   0xd   : > { %p173_p10 = pnand %p762_p6, %p172_p9 }
   0xe   : > { %v942_v0 = vld [vmem:[%s1302_s1] sm:$0xff] (!%p173_p10)   ;;  %s764_s28 = sshll.u32 (!%p173_p10), %s1036_s15, 5  ;;  %v943_v1 = vld [vmem:[%s1302_s1 + $0x8] sm:$0xff] (!%p173_p10)   ;;  %v944_v2 = vld [vmem:[%s1302_s1 + $0x10] sm:$0xff] (!%p173_p10)   ;;  %s200_s30 = sand.u32 (!%p173_p10), 1, %s1028_s13  }
   0xf   : > { %176 = sbr.rel (%p173_p10) target bundleno = 305 (0x131), region = 32  ;;  %p204_p11 = scmp.lt.s32.totalorder (!%p173_p10), %s764_s28, 63  ;;  %821 = vmatprep.subr.bf16.mxu0 (!%p173_p10), %v942_v0  ;;  %869 = vmatprep.subr.bf16.mxu1 (!%p173_p10), %v942_v0  ;;  %v945_v3 = vld [vmem:[%s1302_s1 + $0x18] sm:$0xff] (!%p173_p10)   ;;  %v946_v6 = vld [vmem:[%s1302_s1 + $0x20] sm:$0xff] (!%p173_p10)   ;;  %v947_v7 = vld [vmem:[%s1302_s1 + $0x28] sm:$0xff] (!%p173_p10)  }
  0x10   : > { %822 = vmatpush3.bf16.msra.mxu0 (!%p173_p10), %v942_v0  ;;  %877 = vmatpush3.bf16.msra.mxu1 (!%p173_p10), %v942_v0  ;;  %v948_v8 = vld [vmem:[%s1302_s1 + $0x30] sm:$0xff] (!%p173_p10)   ;;  %v949_v9 = vld [vmem:[%s1302_s1 + $0x38] sm:$0xff] (!%p173_p10)   ;;  %v1174_v24 = vld [vmem:[%s1303_s2] ss:$0 sm:$0xff] (!%p173_p10)  ;;  %s796_s8 = sshll.u32 (!%p173_p10), %s1036_s15, 12  ;;  %s1255_s18 = scalar_lea.sflag (!%p173_p10), [#allocation3], %s200_s30 }
  0x11   : > { %823 = vmatprep.subr.bf16.mxu0 (!%p173_p10), %v943_v1  ;;  %870 = vmatprep.subr.bf16.mxu1 (!%p173_p10), %v943_v1  ;;  %s1243_s11 = scalar_lea.hbm (!%p173_p10), %s1304_s3, %s796_s8  ;;  %s1046_s21 = smov (!%p173_p10), [#allocation2]  }
  0x12   : > { %s970_s23 = sshll.u32 (!%p173_p10), %s1046_s21, 4  ;;  %s971_s23 = int_to_ptr.vmem [resolvable:$false] %s970_s23 }
  0x13   : > { %s972_s26 = scalar_lea.vmem (!%p173_p10), %s971_s23, 8192 }
  0x14   : > { %824 = vmatpush3.bf16.msra.mxu0 (!%p173_p10), %v943_v1  ;;  %878 = vmatpush3.bf16.msra.mxu1 (!%p173_p10), %v943_v1 }
  0x15   : > { %825 = vmatprep.subr.bf16.mxu0 (!%p173_p10), %v944_v2  ;;  %871 = vmatprep.subr.bf16.mxu1 (!%p173_p10), %v944_v2 }
  0x16   : > { %s1315_s28 = smov (!%p204_p11, %s764_s28), 63 }
  0x17   : > { %s765_s6 = sshll.u32 %s1315_s28, 2 }
  0x18   : > { %s1137_s9 = scalar_lea.vmem %s1301_s0, %s765_s6  ;;  %826 = vmatpush3.bf16.msra.mxu0 %v944_v2  ;;  %879 = vmatpush3.bf16.msra.mxu1 %v944_v2  ;;  %s763_s6 = sshll.u32 %s200_s30, 8 }
  0x19   : > { %v950_v4 = vld [vmem:[%s1137_s9] sm:$0xff]   ;;  %827 = vmatprep.subr.bf16.mxu0 %v945_v3  ;;  %872 = vmatprep.subr.bf16.mxu1 %v945_v3  ;;  %v952_v10 = vld [vmem:[%s1137_s9 + $0x8] sm:$0xff]   ;;  %v954_v12 = vld [vmem:[%s1137_s9 + $0x10] sm:$0xff]   ;;  %s1186_s7 = scalar_lea.vmem [#allocation2], %s763_s6 }
  0x1a   : > { %v951_v5 = vld [vmem:[%s1137_s9 + $0x40] sm:$0xff]   ;;  %837 = vmatprep.mubr.bf16.mxu0 %v950_v4  ;;  %v953_v11 = vld [vmem:[%s1137_s9 + $0x48] sm:$0xff]   ;;  %v955_v13 = vld [vmem:[%s1137_s9 + $0x50] sm:$0xff]  }
  0x1b   : > { %853 = vmatprep.mubr.bf16.mxu1 %v951_v5  ;;  %v956_v14 = vld [vmem:[%s1137_s9 + $0x18] sm:$0xff]   ;;  %v958_v16 = vld [vmem:[%s1137_s9 + $0x20] sm:$0xff]   ;;  %v960_v18 = vld [vmem:[%s1137_s9 + $0x28] sm:$0xff]  }
  0x1c   : > { %828 = vmatpush3.bf16.msra.mxu0 %v945_v3  ;;  %880 = vmatpush3.bf16.msra.mxu1 %v945_v3  ;;  %v957_v15 = vld [vmem:[%s1137_s9 + $0x58] sm:$0xff]   ;;  %v959_v17 = vld [vmem:[%s1137_s9 + $0x60] sm:$0xff]   ;;  %v961_v19 = vld [vmem:[%s1137_s9 + $0x68] sm:$0xff]  }
  0x1d   : > { %829 = vmatprep.subr.bf16.mxu0 %v946_v6  ;;  %873 = vmatprep.subr.bf16.mxu1 %v946_v6  ;;  %v962_v20 = vld [vmem:[%s1137_s9 + $0x30] sm:$0xff]   ;;  %v964_v22 = vld [vmem:[%s1137_s9 + $0x38] sm:$0xff]  }
  0x1e   : > { %v963_v21 = vld [vmem:[%s1137_s9 + $0x70] sm:$0xff]   ;;  %v965_v23 = vld [vmem:[%s1137_s9 + $0x78] sm:$0xff]   ;;  %s657_s9 = sshll.u32 %s1186_s7, 4  ;;  %s1245_s9 = int_to_ptr.vmem [resolvable:$true] %s657_s9 }
  0x1f   : > { %s966_s19 = scalar_lea.vmem %s1245_s9, 4096  ;;  %p973_p1 = scmp.lt.s32.totalorder %s1245_s9, %s971_s23 }
  0x20   : > { %830 = vmatpush3.bf16.msra.mxu0 %v946_v6  ;;  %881 = vmatpush3.bf16.msra.mxu1 %v946_v6  ;;  %p967_p12 = scmp.ne.s32.totalorder %s1245_s9, %s966_s19  ;;  %p974_p2 = scmp.lt.s32.totalorder %s972_s26, %s966_s19 }
  0x21   : > { %831 = vmatprep.subr.bf16.mxu0 %v947_v7  ;;  %874 = vmatprep.subr.bf16.mxu1 %v947_v7 }
  0x22   : > { %p968_p13 = pnand %p967_p12, %p1109_p4  ;;  %p975_p3 = por %p974_p2, %p973_p1 }
  0x24   : > { %832 = vmatpush3.bf16.msra.mxu0 %v947_v7  ;;  %882 = vmatpush3.bf16.msra.mxu1 %v947_v7  ;;  %p969_p0 = pneg %p968_p13 }
  0x25   : > { %833 = vmatprep.subr.bf16.mxu0 %v948_v8  ;;  %875 = vmatprep.subr.bf16.mxu1 %v948_v8 }
  0x26   : > { %p976_p5 = pnand %p975_p3, %p969_p0 }
  0x28   : > { %834 = vmatpush3.bf16.msra.mxu0 %v948_v8  ;;  %883 = vmatpush3.bf16.msra.mxu1 %v948_v8 }
  0x29   : > { %835 = vmatprep.subr.bf16.mxu0 %v949_v9  ;;  %876 = vmatprep.subr.bf16.mxu1 %v949_v9 }
  0x2c   : > { %836 = vmatpush3.bf16.msra.mxu0 %v949_v9  ;;  %884 = vmatpush3.bf16.msra.mxu1 %v949_v9 }
  0x2f   : > { %838 = vmatmul.mubr.bf16.vlgmr.msra.gmra.mrb[0].mxu0 %v952_v10  ;;  %854 = vmatmul.mubr.bf16.vlgmr.msra.gmra.mrb[0].mxu1 %v953_v11 }
  0x30   : > { %841 = vmatprep.mubr.bf16.mxu0 %v954_v12  ;;  %857 = vmatprep.mubr.bf16.mxu1 %v955_v13 }
  0x37   : > { %842 = vmatmul.mubr.bf16.gmra.mrb[4].mxu0 %v956_v14  ;;  %858 = vmatmul.mubr.bf16.gmra.mrb[4].mxu1 %v957_v15 }
  0x38   : > { %845 = vmatprep.mubr.bf16.mxu0 %v958_v16  ;;  %861 = vmatprep.mubr.bf16.mxu1 %v959_v17 }
  0x3f   : > { %846 = vmatmul.mubr.bf16.gmra.mrb[8].mxu0 %v960_v18  ;;  %862 = vmatmul.mubr.bf16.gmra.mrb[8].mxu1 %v961_v19 }
  0x40   : > { %849 = vmatprep.mubr.bf16.mxu0 %v962_v20  ;;  %865 = vmatprep.mubr.bf16.mxu1 %v963_v21 }
  0x47   : > { %850 = vmatmul.mubr.bf16.gmra.mrb[12].mxu0 %v964_v22  ;;  %866 = vmatmul.mubr.bf16.gmra.mrb[12].mxu1 %v965_v23 }
 0x102   : > { %v839_v25 = vpop.f32.mrb[0].mxu0  ;;  %v855_v26 = vpop.f32.mrb[0].mxu1 }
 0x103   : > { %v460_v27 = vadd.f32 %v839_v25, %v1174_v24  ;;  %v524_v28 = vadd.f32 %v855_v26, %v1174_v24  ;;  %v451_v29 = vpop.f32.mrb[1].mxu0  ;;  %v515_v30 = vpop.f32.mrb[1].mxu1 }
 0x104   : > { %v452_v31 = vadd.f32 %v1174_v24, %v451_v29  ;;  %v516_v32 = vadd.f32 %v1174_v24, %v515_v30  ;;  %v840_v33 = vpop.f32.mrb[2].mxu0  ;;  %v856_v34 = vpop.f32.mrb[2].mxu1 }
 0x105   : > { %v580_v35 = vmax.f32 %v460_v27, 0.0  ;;  %v596_v36 = vmax.f32 %v524_v28, 0.0  ;;  %v463_v37 = vadd.f32 %v840_v33, %v1174_v24  ;;  %v527_v38 = vadd.f32 %v856_v34, %v1174_v24  ;;  %v454_v39 = vpop.f32.mrb[3].mxu0  ;;  %v518_v40 = vpop.f32.mrb[3].mxu1 }
 0x106   : > { %v578_v41 = vmax.f32 %v452_v31, 0.0  ;;  %v594_v42 = vmax.f32 %v516_v32, 0.0  ;;  %v455_v43 = vadd.f32 %v1174_v24, %v454_v39  ;;  %v519_v44 = vadd.f32 %v1174_v24, %v518_v40 }
 0x107   : > { %612 = vst [vmem:[%s1186_s7 + $0x10] sm:$0xff] %v580_v35  ;;  %628 = vst [vmem:[%s1186_s7 + $0x90] sm:$0xff] %v596_v36  ;;  %v581_v45 = vmax.f32 %v463_v37, 0.0  ;;  %v597_v46 = vmax.f32 %v527_v38, 0.0 }
 0x108   : > { %610 = vst [vmem:[%s1186_s7] sm:$0xff] %v578_v41  ;;  %626 = vst [vmem:[%s1186_s7 + $0x80] sm:$0xff] %v594_v42  ;;  %v579_v47 = vmax.f32 %v455_v43, 0.0  ;;  %v595_v48 = vmax.f32 %v519_v44, 0.0 }
 0x109   : > { %613 = vst [vmem:[%s1186_s7 + $0x18] sm:$0xff] %v581_v45  ;;  %629 = vst [vmem:[%s1186_s7 + $0x98] sm:$0xff] %v597_v46 }
 0x10a   : > { %611 = vst [vmem:[%s1186_s7 + $0x8] sm:$0xff] %v579_v47  ;;  %627 = vst [vmem:[%s1186_s7 + $0x88] sm:$0xff] %v595_v48  ;;  %v843_v49 = vpop.f32.mrb[4].mxu0  ;;  %v859_v50 = vpop.f32.mrb[4].mxu1 }
 0x10b   : > { %v476_v51 = vadd.f32 %v843_v49, %v1174_v24  ;;  %v540_v52 = vadd.f32 %v859_v50, %v1174_v24  ;;  %v467_v53 = vpop.f32.mrb[5].mxu0  ;;  %v531_v54 = vpop.f32.mrb[5].mxu1 }
 0x10c   : > { %v468_v55 = vadd.f32 %v1174_v24, %v467_v53  ;;  %v532_v56 = vadd.f32 %v1174_v24, %v531_v54  ;;  %v844_v57 = vpop.f32.mrb[6].mxu0  ;;  %v860_v58 = vpop.f32.mrb[6].mxu1 }
 0x10d   : > { %v584_v59 = vmax.f32 %v476_v51, 0.0  ;;  %v600_v60 = vmax.f32 %v540_v52, 0.0  ;;  %v479_v61 = vadd.f32 %v844_v57, %v1174_v24  ;;  %v543_v62 = vadd.f32 %v860_v58, %v1174_v24  ;;  %v470_v63 = vpop.f32.mrb[7].mxu0  ;;  %v534_v0 = vpop.f32.mrb[7].mxu1 }
 0x10e   : > { %v582_v1 = vmax.f32 %v468_v55, 0.0  ;;  %v598_v2 = vmax.f32 %v532_v56, 0.0  ;;  %v471_v3 = vadd.f32 %v1174_v24, %v470_v63  ;;  %v535_v4 = vadd.f32 %v1174_v24, %v534_v0 }
 0x10f   : > { %616 = vst [vmem:[%s1186_s7 + $0x30] sm:$0xff] %v584_v59  ;;  %632 = vst [vmem:[%s1186_s7 + $0xb0] sm:$0xff] %v600_v60  ;;  %v585_v5 = vmax.f32 %v479_v61, 0.0  ;;  %v601_v6 = vmax.f32 %v543_v62, 0.0 }
 0x110   : > { %614 = vst [vmem:[%s1186_s7 + $0x20] sm:$0xff] %v582_v1  ;;  %630 = vst [vmem:[%s1186_s7 + $0xa0] sm:$0xff] %v598_v2  ;;  %v583_v7 = vmax.f32 %v471_v3, 0.0  ;;  %v599_v8 = vmax.f32 %v535_v4, 0.0 }
 0x111   : > { %617 = vst [vmem:[%s1186_s7 + $0x38] sm:$0xff] %v585_v5  ;;  %633 = vst [vmem:[%s1186_s7 + $0xb8] sm:$0xff] %v601_v6 }
 0x112   : > { %615 = vst [vmem:[%s1186_s7 + $0x28] sm:$0xff] %v583_v7  ;;  %631 = vst [vmem:[%s1186_s7 + $0xa8] sm:$0xff] %v599_v8  ;;  %v847_v9 = vpop.f32.mrb[8].mxu0  ;;  %v863_v10 = vpop.f32.mrb[8].mxu1 }
 0x113   : > { %v492_v11 = vadd.f32 %v847_v9, %v1174_v24  ;;  %v556_v12 = vadd.f32 %v863_v10, %v1174_v24  ;;  %v483_v13 = vpop.f32.mrb[9].mxu0  ;;  %v547_v14 = vpop.f32.mrb[9].mxu1 }
 0x114   : > { %v484_v15 = vadd.f32 %v1174_v24, %v483_v13  ;;  %v548_v16 = vadd.f32 %v1174_v24, %v547_v14  ;;  %v848_v17 = vpop.f32.mrb[10].mxu0  ;;  %v864_v18 = vpop.f32.mrb[10].mxu1 }
 0x115   : > { %v588_v19 = vmax.f32 %v492_v11, 0.0  ;;  %v604_v20 = vmax.f32 %v556_v12, 0.0  ;;  %v495_v21 = vadd.f32 %v848_v17, %v1174_v24  ;;  %v559_v22 = vadd.f32 %v864_v18, %v1174_v24  ;;  %v486_v23 = vpop.f32.mrb[11].mxu0  ;;  %v550_v25 = vpop.f32.mrb[11].mxu1 }
 0x116   : > { %v586_v26 = vmax.f32 %v484_v15, 0.0  ;;  %v602_v27 = vmax.f32 %v548_v16, 0.0  ;;  %v487_v28 = vadd.f32 %v1174_v24, %v486_v23  ;;  %v551_v29 = vadd.f32 %v1174_v24, %v550_v25 }
 0x117   : > { %620 = vst [vmem:[%s1186_s7 + $0x50] sm:$0xff] %v588_v19  ;;  %636 = vst [vmem:[%s1186_s7 + $0xd0] sm:$0xff] %v604_v20  ;;  %v589_v30 = vmax.f32 %v495_v21, 0.0  ;;  %v605_v31 = vmax.f32 %v559_v22, 0.0 }
 0x118   : > { %618 = vst [vmem:[%s1186_s7 + $0x40] sm:$0xff] %v586_v26  ;;  %634 = vst [vmem:[%s1186_s7 + $0xc0] sm:$0xff] %v602_v27  ;;  %v587_v32 = vmax.f32 %v487_v28, 0.0  ;;  %v603_v33 = vmax.f32 %v551_v29, 0.0 }
 0x119   : > { %621 = vst [vmem:[%s1186_s7 + $0x58] sm:$0xff] %v589_v30  ;;  %637 = vst [vmem:[%s1186_s7 + $0xd8] sm:$0xff] %v605_v31 }
 0x11a   : > { %619 = vst [vmem:[%s1186_s7 + $0x48] sm:$0xff] %v587_v32  ;;  %635 = vst [vmem:[%s1186_s7 + $0xc8] sm:$0xff] %v603_v33  ;;  %v851_v34 = vpop.f32.mrb[12].mxu0  ;;  %v867_v35 = vpop.f32.mrb[12].mxu1 }
 0x11b   : > { %v508_v36 = vadd.f32 %v851_v34, %v1174_v24  ;;  %v572_v37 = vadd.f32 %v867_v35, %v1174_v24  ;;  %v499_v38 = vpop.f32.mrb[13].mxu0  ;;  %v563_v39 = vpop.f32.mrb[13].mxu1 }
 0x11c   : > { %v500_v40 = vadd.f32 %v1174_v24, %v499_v38  ;;  %v564_v41 = vadd.f32 %v1174_v24, %v563_v39  ;;  %v852_v42 = vpop.f32.mrb[14].mxu0  ;;  %v868_v43 = vpop.f32.mrb[14].mxu1 }
 0x11d   : > { %v592_v44 = vmax.f32 %v508_v36, 0.0  ;;  %v608_v45 = vmax.f32 %v572_v37, 0.0  ;;  %v511_v46 = vadd.f32 %v852_v42, %v1174_v24  ;;  %v575_v47 = vadd.f32 %v868_v43, %v1174_v24  ;;  %v502_v48 = vpop.f32.mrb[15].mxu0  ;;  %v566_v49 = vpop.f32.mrb[15].mxu1 }
 0x11e   : > { %v590_v50 = vmax.f32 %v500_v40, 0.0  ;;  %v606_v51 = vmax.f32 %v564_v41, 0.0  ;;  %v503_v52 = vadd.f32 %v1174_v24, %v502_v48  ;;  %v567_v53 = vadd.f32 %v1174_v24, %v566_v49 }
 0x11f   : > { %624 = vst [vmem:[%s1186_s7 + $0x70] sm:$0xff] %v592_v44  ;;  %640 = vst [vmem:[%s1186_s7 + $0xf0] sm:$0xff] %v608_v45  ;;  %v593_v54 = vmax.f32 %v511_v46, 0.0  ;;  %v609_v55 = vmax.f32 %v575_v47, 0.0 }
 0x120   : > { %622 = vst [vmem:[%s1186_s7 + $0x60] sm:$0xff] %v590_v50  ;;  %638 = vst [vmem:[%s1186_s7 + $0xe0] sm:$0xff] %v606_v51  ;;  %v591_v56 = vmax.f32 %v503_v52, 0.0  ;;  %v607_v57 = vmax.f32 %v567_v53, 0.0 }
 0x121   : > { %625 = vst [vmem:[%s1186_s7 + $0x78] sm:$0xff] %v593_v54  ;;  %641 = vst [vmem:[%s1186_s7 + $0xf8] sm:$0xff] %v609_v55 }
 0x122   : > { %623 = vst [vmem:[%s1186_s7 + $0x68] sm:$0xff] %v591_v56  ;;  %639 = vst [vmem:[%s1186_s7 + $0xe8] sm:$0xff] %v607_v57 }
 0x123   : > { %979 = shalt.err (!%p976_p5)
}
 0x124   : > { %s980_s27 = scalar_lea.hbm %s1243_s11, 4096  ;;  %s984_s30 = scalar_lea.hbm %s1304_s3, 8192 }
 0x125   : > { %p981_p6 = scmp.ne.s32.totalorder %s1243_s11, %s980_s27  ;;  %p985_p10 = scmp.lt.u32.totalorder %s1243_s11, %s1304_s3 }
 0x126   : > { %p986_p11 = scmp.lt.u32.totalorder %s984_s30, %s980_s27  ;;  %p988_p13 = scmp.lt.u32.totalorder %s980_s27, %s1243_s11 }
 0x127   : > { %p982_p7 = pnand %p981_p6, %p1109_p4 }
 0x128   : > { %p987_p12 = por %p986_p11, %p985_p10 }
 0x129   : > { %p983_p9 = pneg %p982_p7 }
 0x12a   : > { %p989_p0 = por %p988_p13, %p987_p12 }
 0x12c   : > { %p990_p1 = pnand %p989_p0, %p983_p9 }
 0x12e   : > { %993 = shalt.err (!%p990_p1)
}
 0x12f   : > { %s1047_s6 = smov 128   ;;  %s1048_s7 = smov 8  }
 0x130   : > { %885 = dma.vmem_to_hbm [thread:$0]  (%p1109_p4), %s1245_s9, 4096, %s1243_s11, %s1255_s18, %s1047_s6, %s1047_s6, %s1048_s7  }
 0x131 PF: > { %p891_p2 = scmp.ge.s32.totalorder %s1044_s17, 2  ;;  %s672_s8 = sand.u32 1, %s1024_s12  }
 0x132   : > { %s673_s15 = scalar_lea.sflag [#allocation3], %s672_s8 }
 0x133   : > { %p888_p3 = pnand %p891_p2, %p1116_p8 }
 0x135   : > { %1019 = dma.done.wait (!%p888_p3), %s673_s15, 4096  }
 0x136   : > { %1021 = vsyncadd (!%p888_p3), %s673_s15, 4294963200  ;;  %s16_s17 = sadd.s32 1, %s1044_s17   ;;  %s1307_s12 = smov %s1028_s13 }
 0x137   : > { %p13_p5 = scmp.ge.s32.totalorder %s16_s17, 4   ;;  %s1308_s13 = smov %s1032_s14 }
 0x138   : > { %s1309_s14 = smov %s1122_s25  ;;  %s1310_s15 = smov %s1040_s16 }
 0x139   : > { %s1311_s16 = smov %s1313_s20  ;;  %15 = sbr.rel (!%p13_p5) target bundleno = 4 (0x4), region = 73 }
 0x140   :  { %678 = vsyncpa [#allocation3], 1 }
 0x141   :  { %680 = vsyncpa [#allocation3 + $0x1], 1 }

</bundles_post_ra>
